<compile_context>
chip_gen: v7x
topology: tpu7x:2x2x1
jax: 0.10.0
libtpu: 0.0.40
codegen_flags: <defaults>
</compile_context>

<pallas_src>
import jax
import jax.numpy as jnp
from jax import lax
from jax.experimental import pallas as pl
from jax.experimental.pallas import tpu as pltpu


def _elu(x):
    # ELU(alpha=1): x > 0 -> x ; x <= 0 -> expm1(x).
    # expm1 via the tanh half-angle identity: expm1(z) = 2*tanh(z/2)/(1 - tanh(z/2)).
    # No cancellation for small |z| (tanh goes to the EUP; div is cheap).
    z = jnp.minimum(x, 0.0)
    t = jnp.tanh(0.5 * z)
    em1 = (2.0 * t) / (1.0 - t)
    return jnp.where(x > 0, x, em1)


def _make_fused_kernel(H, W, num_layers):
    HW = H * W
    taps = [(dy, dx) for dy in range(3) for dx in range(3)]

    def kernel(mask_ref, x_ref, *rest):
        # mask_ref: (9, 1, HW) f32 boundary masks (1 = in-bounds), one per tap.
        # x_ref:    (1, C0_p, HW) f32 input activations (channel-padded).
        # rest:     w2_0, b_0, w2_1, b_1, ..., o_ref
        #   w2_l: (Cout_p, 9*Cin_p)  packed conv weights (tap-major along K)
        #   b_l:  (Cout_p, 1)
        #   o_ref: (1, Clast_p, HW)
        o_ref = rest[-1]
        wb = rest[:-1]

        # Load the 9 masks once; reused by every layer.
        masks = [mask_ref[t] for t in range(9)]        # each (1, HW)

        act = x_ref[0]                                  # (Cin_p, HW) f32
        for layer in range(num_layers):
            w2 = wb[2 * layer][...]                     # (Cout_p, 9*Cin_p)
            b = wb[2 * layer + 1][...]                  # (Cout_p, 1)

            # Build im2col = (9*Cin_p, HW): tap t rows are the input shifted by
            # (dy-1, dx-1), zeroed where the shift falls outside the image.
            cols = []
            for t, (dy, dx) in enumerate(taps):
                off = (dy - 1) * W + (dx - 1)
                if off == 0:
                    cols.append(act)                    # center tap: no shift, no mask
                else:
                    rolled = pltpu.roll(act, (-off) % HW, axis=1)
                    cols.append(rolled * masks[t])
            im2col = jnp.concatenate(cols, axis=0)      # (9*Cin_p, HW)

            acc = jnp.dot(w2, im2col, preferred_element_type=jnp.float32)
            acc = acc + b                               # bias broadcast over lanes
            act = _elu(acc)                             # (Cout_p, HW)

        o_ref[0] = act.astype(o_ref.dtype)

    return kernel


def _rup8(c):
    return ((c + 7) // 8) * 8


def field_cnn_forward(x_nchw, params):
    """PyTorch semantics: (B, E, h, w) -> (B, H) with H = last_channel * h * w."""
    B, C0, H, W = x_nchw.shape
    HW = H * W
    num_layers = len(params)

    # Input: (B, C, H, W) -> (B, C_p, H*W), channels zero-padded to a multiple of 8.
    C0_p = _rup8(C0)
    x = x_nchw.reshape(B, C0, HW).astype(jnp.float32)
    if C0_p != C0:
        x = jnp.pad(x, ((0, 0), (0, C0_p - C0), (0, 0)))

    # Pack per-layer weights as (Cout_p, 9*Cin_p) matmul operands + (Cout_p, 1) bias.
    wb_arrays = []
    wb_specs = []
    cin = C0
    for (w, b) in params:                      # w: (3, 3, Cin, Cout) HWIO, b: (Cout,)
        Cin, Cout = w.shape[2], w.shape[3]
        assert Cin == cin
        Cin_p, Cout_p = _rup8(Cin), _rup8(Cout)
        w_p = jnp.zeros((3, 3, Cin_p, Cout_p), jnp.float32).at[:, :, :Cin, :Cout].set(w)
        # w2[co, t*Cin_p + ci] = w[dy, dx, ci, co] with t = dy*3 + dx.
        w2 = w_p.reshape(9, Cin_p, Cout_p).transpose(2, 0, 1).reshape(Cout_p, 9 * Cin_p)
        b_p = jnp.zeros((Cout_p, 1), jnp.float32).at[:Cout, 0].set(b)
        wb_arrays += [w2, b_p]
        wb_specs += [
            pl.BlockSpec((Cout_p, 9 * Cin_p), lambda bi: (0, 0)),
            pl.BlockSpec((Cout_p, 1), lambda bi: (0, 0)),
        ]
        cin = Cout
    Cl = cin
    Cl_p = _rup8(Cl)

    # Boundary masks for the 9 taps: masks[t, 0, y*W+x] = 1 iff (y+dy-1, x+dx-1) in range.
    taps = [(dy, dx) for dy in range(3) for dx in range(3)]
    ys, xs = jnp.meshgrid(jnp.arange(H), jnp.arange(W), indexing="ij")
    masks = jnp.stack(
        [(((ys + dy - 1) >= 0) & ((ys + dy - 1) < H) &
          ((xs + dx - 1) >= 0) & ((xs + dx - 1) < W)).reshape(1, HW)
         for dy, dx in taps], axis=0).astype(jnp.float32)            # (9, 1, HW)

    kernel = _make_fused_kernel(H, W, num_layers)

    out = pl.pallas_call(
        kernel,
        out_shape=jax.ShapeDtypeStruct((B, Cl_p, HW), jnp.float32),
        grid_spec=pltpu.PrefetchScalarGridSpec(
            num_scalar_prefetch=0,
            grid=(B,),
            in_specs=[
                pl.BlockSpec((9, 1, HW), lambda bi: (0, 0, 0)),      # tap masks
                pl.BlockSpec((1, C0_p, HW), lambda bi: (bi, 0, 0)),  # input activations
            ] + wb_specs,
            out_specs=pl.BlockSpec((1, Cl_p, HW), lambda bi: (bi, 0, 0)),
        ),
        compiler_params=pltpu.CompilerParams(
            dimension_semantics=("parallel",)),
    )(masks, x, *wb_arrays)

    # (B, C_last, H*W) is already torch's NCHW flatten(1) (C-major) order.
    return out[:, :Cl, :].reshape(B, Cl * HW)


def init_field_cnn_params(key, emb_dim, cnn_depth, mid_channel, last_channel):
    """Deterministic synthetic parameters with the shapes FieldCnn.__init__ implies."""
    if cnn_depth > 1:
        chans = [emb_dim] + [mid_channel] * (cnn_depth - 1) + [last_channel]
    elif cnn_depth == 1:
        chans = [emb_dim, last_channel]
    else:
        raise ValueError(f"cnn_depth == {cnn_depth}")
    params = []
    for cin, cout in zip(chans[:-1], chans[1:]):
        key, kw, kb = jax.random.split(key, 3)
        w = jax.random.normal(kw, (3, 3, cin, cout), jnp.float32) * 0.1  # HWIO
        b = jax.random.normal(kb, (cout,), jnp.float32) * 0.1
        params.append((w, b))
    return params


def field_cnn_reference(x_nchw, params):
    """Pure-JAX reference (same math, XLA conv) for the correctness check."""
    x = x_nchw
    for w, b in params:
        w_oihw = jnp.transpose(w, (3, 2, 0, 1))
        x = lax.conv_general_dilated(
            x, w_oihw, window_strides=(1, 1), padding=((1, 1), (1, 1)),
            dimension_numbers=("NCHW", "OIHW", "NCHW"),
            precision=lax.Precision.HIGHEST)
        x = x + b[None, :, None, None]
        x = jnp.where(x > 0, x, jnp.expm1(jnp.minimum(x, 0.0)))
    return x.reshape(x.shape[0], -1)


if __name__ == "__main__":
    # Small shapes consistent with the module's forward: (B, E, h, w) -> (B, H)
    B, emb_dim, height, width = 2, 4, 16, 16
    cnn_depth, mid_channel, last_channel = 3, 8, 8

    key = jax.random.PRNGKey(0)
    key, kx, kp = jax.random.split(key, 3)
    x = jax.random.normal(kx, (B, emb_dim, height, width), jnp.float32)
    params = init_field_cnn_params(kp, emb_dim, cnn_depth, mid_channel, last_channel)

    fwd = jax.jit(field_cnn_forward)
    out = jax.block_until_ready(fwd(x, params))

    ref = jax.block_until_ready(field_cnn_reference(x, params))
    assert out.shape == (B, last_channel * height * width), out.shape
    max_err = float(jnp.max(jnp.abs(out - ref)))
    assert jnp.allclose(out, ref, atol=1e-2, rtol=1e-2), max_err

    print("KERNEL_OK")
</pallas_src>

<mosaic_0001>
module attributes {stable_mosaic.version = 11 : i64} {
  func.func @kernel(%arg0: i32, %arg1: memref<9x1x256xf32, #tpu.memory_space<vmem>>, %arg2: memref<1x8x256xf32, #tpu.memory_space<vmem>>, %arg3: memref<8x72xf32, #tpu.memory_space<vmem>>, %arg4: memref<8x1xf32, #tpu.memory_space<vmem>>, %arg5: memref<8x72xf32, #tpu.memory_space<vmem>>, %arg6: memref<8x1xf32, #tpu.memory_space<vmem>>, %arg7: memref<8x72xf32, #tpu.memory_space<vmem>>, %arg8: memref<8x1xf32, #tpu.memory_space<vmem>>, %arg9: memref<1x8x256xf32, #tpu.memory_space<vmem>>) attributes {dimension_semantics = [#tpu.dimension_semantics<parallel>], iteration_bounds = array<i64: 2>, scalar_prefetch = 0 : i64, scratch_operands = 0 : i64, tpu.core_type = #tpu.core_type<tc>, window_params = [{pipeline_mode = #tpu.pipeline_mode<synchronous>, transform_indices = @transform_0, window_bounds = array<i64: 9, 1, 256>}, {transform_indices = @transform_1, window_bounds = array<i64: 1, 8, 256>}, {pipeline_mode = #tpu.pipeline_mode<synchronous>, transform_indices = @transform_2, window_bounds = array<i64: 8, 72>}, {pipeline_mode = #tpu.pipeline_mode<synchronous>, transform_indices = @transform_3, window_bounds = array<i64: 8, 1>}, {pipeline_mode = #tpu.pipeline_mode<synchronous>, transform_indices = @transform_4, window_bounds = array<i64: 8, 72>}, {pipeline_mode = #tpu.pipeline_mode<synchronous>, transform_indices = @transform_5, window_bounds = array<i64: 8, 1>}, {pipeline_mode = #tpu.pipeline_mode<synchronous>, transform_indices = @transform_6, window_bounds = array<i64: 8, 72>}, {pipeline_mode = #tpu.pipeline_mode<synchronous>, transform_indices = @transform_7, window_bounds = array<i64: 8, 1>}, {transform_indices = @transform_8, window_bounds = array<i64: 1, 8, 256>}]} {
    %c0 = arith.constant 0 : index
    %c0_0 = arith.constant 0 : index
    %c0_1 = arith.constant 0 : index
    %0 = vector.load %arg1[%c0, %c0_0, %c0_1] : memref<9x1x256xf32, #tpu.memory_space<vmem>>, vector<1x1x256xf32>
    %1 = vector.shape_cast %0 : vector<1x1x256xf32> to vector<1x256xf32>
    %c1 = arith.constant 1 : index
    %c0_2 = arith.constant 0 : index
    %c0_3 = arith.constant 0 : index
    %2 = vector.load %arg1[%c1, %c0_2, %c0_3] : memref<9x1x256xf32, #tpu.memory_space<vmem>>, vector<1x1x256xf32>
    %3 = vector.shape_cast %2 : vector<1x1x256xf32> to vector<1x256xf32>
    %c2 = arith.constant 2 : index
    %c0_4 = arith.constant 0 : index
    %c0_5 = arith.constant 0 : index
    %4 = vector.load %arg1[%c2, %c0_4, %c0_5] : memref<9x1x256xf32, #tpu.memory_space<vmem>>, vector<1x1x256xf32>
    %5 = vector.shape_cast %4 : vector<1x1x256xf32> to vector<1x256xf32>
    %c3 = arith.constant 3 : index
    %c0_6 = arith.constant 0 : index
    %c0_7 = arith.constant 0 : index
    %6 = vector.load %arg1[%c3, %c0_6, %c0_7] : memref<9x1x256xf32, #tpu.memory_space<vmem>>, vector<1x1x256xf32>
    %7 = vector.shape_cast %6 : vector<1x1x256xf32> to vector<1x256xf32>
    %c5 = arith.constant 5 : index
    %c0_8 = arith.constant 0 : index
    %c0_9 = arith.constant 0 : index
    %8 = vector.load %arg1[%c5, %c0_8, %c0_9] : memref<9x1x256xf32, #tpu.memory_space<vmem>>, vector<1x1x256xf32>
    %9 = vector.shape_cast %8 : vector<1x1x256xf32> to vector<1x256xf32>
    %c6 = arith.constant 6 : index
    %c0_10 = arith.constant 0 : index
    %c0_11 = arith.constant 0 : index
    %10 = vector.load %arg1[%c6, %c0_10, %c0_11] : memref<9x1x256xf32, #tpu.memory_space<vmem>>, vector<1x1x256xf32>
    %11 = vector.shape_cast %10 : vector<1x1x256xf32> to vector<1x256xf32>
    %c7 = arith.constant 7 : index
    %c0_12 = arith.constant 0 : index
    %c0_13 = arith.constant 0 : index
    %12 = vector.load %arg1[%c7, %c0_12, %c0_13] : memref<9x1x256xf32, #tpu.memory_space<vmem>>, vector<1x1x256xf32>
    %13 = vector.shape_cast %12 : vector<1x1x256xf32> to vector<1x256xf32>
    %c8 = arith.constant 8 : index
    %c0_14 = arith.constant 0 : index
    %c0_15 = arith.constant 0 : index
    %14 = vector.load %arg1[%c8, %c0_14, %c0_15] : memref<9x1x256xf32, #tpu.memory_space<vmem>>, vector<1x1x256xf32>
    %15 = vector.shape_cast %14 : vector<1x1x256xf32> to vector<1x256xf32>
    %c0_16 = arith.constant 0 : index
    %c0_17 = arith.constant 0 : index
    %c0_18 = arith.constant 0 : index
    %16 = vector.load %arg2[%c0_16, %c0_17, %c0_18] : memref<1x8x256xf32, #tpu.memory_space<vmem>>, vector<1x8x256xf32>
    %17 = vector.shape_cast %16 : vector<1x8x256xf32> to vector<8x256xf32>
    %c0_19 = arith.constant 0 : index
    %c0_20 = arith.constant 0 : index
    %18 = vector.load %arg3[%c0_19, %c0_20] : memref<8x72xf32, #tpu.memory_space<vmem>>, vector<8x72xf32>
    %c0_21 = arith.constant 0 : index
    %c0_22 = arith.constant 0 : index
    %19 = vector.load %arg4[%c0_21, %c0_22] : memref<8x1xf32, #tpu.memory_space<vmem>>, vector<8x1xf32>
    %c17_i32 = arith.constant 17 : i32
    %20 = tpu.dynamic_rotate %17 by %c17_i32 dim 1 : vector<8x256xf32>, i32 -> vector<8x256xf32>
    %21 = vector.broadcast %1 : vector<1x256xf32> to vector<8x256xf32>
    %22 = arith.mulf %20, %21 : vector<8x256xf32>
    %c16_i32 = arith.constant 16 : i32
    %23 = tpu.dynamic_rotate %17 by %c16_i32 dim 1 : vector<8x256xf32>, i32 -> vector<8x256xf32>
    %24 = vector.broadcast %3 : vector<1x256xf32> to vector<8x256xf32>
    %25 = arith.mulf %23, %24 : vector<8x256xf32>
    %c15_i32 = arith.constant 15 : i32
    %26 = tpu.dynamic_rotate %17 by %c15_i32 dim 1 : vector<8x256xf32>, i32 -> vector<8x256xf32>
    %27 = vector.broadcast %5 : vector<1x256xf32> to vector<8x256xf32>
    %28 = arith.mulf %26, %27 : vector<8x256xf32>
    %c1_i32 = arith.constant 1 : i32
    %29 = tpu.dynamic_rotate %17 by %c1_i32 dim 1 : vector<8x256xf32>, i32 -> vector<8x256xf32>
    %30 = vector.broadcast %7 : vector<1x256xf32> to vector<8x256xf32>
    %31 = arith.mulf %29, %30 : vector<8x256xf32>
    %c255_i32 = arith.constant 255 : i32
    %32 = tpu.dynamic_rotate %17 by %c255_i32 dim 1 : vector<8x256xf32>, i32 -> vector<8x256xf32>
    %33 = vector.broadcast %9 : vector<1x256xf32> to vector<8x256xf32>
    %34 = arith.mulf %32, %33 : vector<8x256xf32>
    %c241_i32 = arith.constant 241 : i32
    %35 = tpu.dynamic_rotate %17 by %c241_i32 dim 1 : vector<8x256xf32>, i32 -> vector<8x256xf32>
    %36 = vector.broadcast %11 : vector<1x256xf32> to vector<8x256xf32>
    %37 = arith.mulf %35, %36 : vector<8x256xf32>
    %c240_i32 = arith.constant 240 : i32
    %38 = tpu.dynamic_rotate %17 by %c240_i32 dim 1 : vector<8x256xf32>, i32 -> vector<8x256xf32>
    %39 = vector.broadcast %13 : vector<1x256xf32> to vector<8x256xf32>
    %40 = arith.mulf %38, %39 : vector<8x256xf32>
    %c239_i32 = arith.constant 239 : i32
    %41 = tpu.dynamic_rotate %17 by %c239_i32 dim 1 : vector<8x256xf32>, i32 -> vector<8x256xf32>
    %42 = vector.broadcast %15 : vector<1x256xf32> to vector<8x256xf32>
    %43 = arith.mulf %41, %42 : vector<8x256xf32>
    %44 = tpu.concatenate %22, %25, %28, %31, %17, %34, %37, %40, %43 in 0 : vector<8x256xf32>, vector<8x256xf32>, vector<8x256xf32>, vector<8x256xf32>, vector<8x256xf32>, vector<8x256xf32>, vector<8x256xf32>, vector<8x256xf32>, vector<8x256xf32> -> vector<72x256xf32>
    %cst = arith.constant dense<0.000000e+00> : vector<8x256xf32>
    %45 = tpu.matmul %18, %44, %cst {dimension_numbers = #tpu.dot_dimension_numbers<[1], [0], [0], [1], [0, 0, 1, 1], [], []>} : vector<8x72xf32>, vector<72x256xf32>, vector<8x256xf32> -> vector<8x256xf32>
    %46 = vector.broadcast %19 : vector<8x1xf32> to vector<8x256xf32>
    %47 = arith.addf %45, %46 : vector<8x256xf32>
    %cst_23 = arith.constant 0.000000e+00 : f32
    %48 = vector.broadcast %cst_23 : f32 to vector<8x256xf32>
    %49 = arith.minimumf %47, %48 : vector<8x256xf32>
    %cst_24 = arith.constant 5.000000e-01 : f32
    %50 = vector.broadcast %cst_24 : f32 to vector<8x256xf32>
    %51 = arith.mulf %50, %49 : vector<8x256xf32>
    %52 = math.tanh %51 : vector<8x256xf32>
    %cst_25 = arith.constant 2.000000e+00 : f32
    %53 = vector.broadcast %cst_25 : f32 to vector<8x256xf32>
    %54 = arith.mulf %53, %52 : vector<8x256xf32>
    %cst_26 = arith.constant 1.000000e+00 : f32
    %55 = vector.broadcast %cst_26 : f32 to vector<8x256xf32>
    %56 = arith.subf %55, %52 : vector<8x256xf32>
    %57 = arith.divf %54, %56 : vector<8x256xf32>
    %cst_27 = arith.constant 0.000000e+00 : f32
    %58 = vector.broadcast %cst_27 : f32 to vector<8x256xf32>
    %59 = arith.cmpf ogt, %47, %58 : vector<8x256xf32>
    %60 = arith.select %59, %47, %57 : vector<8x256xi1>, vector<8x256xf32>
    %c0_28 = arith.constant 0 : index
    %c0_29 = arith.constant 0 : index
    %61 = vector.load %arg5[%c0_28, %c0_29] : memref<8x72xf32, #tpu.memory_space<vmem>>, vector<8x72xf32>
    %c0_30 = arith.constant 0 : index
    %c0_31 = arith.constant 0 : index
    %62 = vector.load %arg6[%c0_30, %c0_31] : memref<8x1xf32, #tpu.memory_space<vmem>>, vector<8x1xf32>
    %c17_i32_32 = arith.constant 17 : i32
    %63 = tpu.dynamic_rotate %60 by %c17_i32_32 dim 1 : vector<8x256xf32>, i32 -> vector<8x256xf32>
    %64 = vector.broadcast %1 : vector<1x256xf32> to vector<8x256xf32>
    %65 = arith.mulf %63, %64 : vector<8x256xf32>
    %c16_i32_33 = arith.constant 16 : i32
    %66 = tpu.dynamic_rotate %60 by %c16_i32_33 dim 1 : vector<8x256xf32>, i32 -> vector<8x256xf32>
    %67 = vector.broadcast %3 : vector<1x256xf32> to vector<8x256xf32>
    %68 = arith.mulf %66, %67 : vector<8x256xf32>
    %c15_i32_34 = arith.constant 15 : i32
    %69 = tpu.dynamic_rotate %60 by %c15_i32_34 dim 1 : vector<8x256xf32>, i32 -> vector<8x256xf32>
    %70 = vector.broadcast %5 : vector<1x256xf32> to vector<8x256xf32>
    %71 = arith.mulf %69, %70 : vector<8x256xf32>
    %c1_i32_35 = arith.constant 1 : i32
    %72 = tpu.dynamic_rotate %60 by %c1_i32_35 dim 1 : vector<8x256xf32>, i32 -> vector<8x256xf32>
    %73 = vector.broadcast %7 : vector<1x256xf32> to vector<8x256xf32>
    %74 = arith.mulf %72, %73 : vector<8x256xf32>
    %c255_i32_36 = arith.constant 255 : i32
    %75 = tpu.dynamic_rotate %60 by %c255_i32_36 dim 1 : vector<8x256xf32>, i32 -> vector<8x256xf32>
    %76 = vector.broadcast %9 : vector<1x256xf32> to vector<8x256xf32>
    %77 = arith.mulf %75, %76 : vector<8x256xf32>
    %c241_i32_37 = arith.constant 241 : i32
    %78 = tpu.dynamic_rotate %60 by %c241_i32_37 dim 1 : vector<8x256xf32>, i32 -> vector<8x256xf32>
    %79 = vector.broadcast %11 : vector<1x256xf32> to vector<8x256xf32>
    %80 = arith.mulf %78, %79 : vector<8x256xf32>
    %c240_i32_38 = arith.constant 240 : i32
    %81 = tpu.dynamic_rotate %60 by %c240_i32_38 dim 1 : vector<8x256xf32>, i32 -> vector<8x256xf32>
    %82 = vector.broadcast %13 : vector<1x256xf32> to vector<8x256xf32>
    %83 = arith.mulf %81, %82 : vector<8x256xf32>
    %c239_i32_39 = arith.constant 239 : i32
    %84 = tpu.dynamic_rotate %60 by %c239_i32_39 dim 1 : vector<8x256xf32>, i32 -> vector<8x256xf32>
    %85 = vector.broadcast %15 : vector<1x256xf32> to vector<8x256xf32>
    %86 = arith.mulf %84, %85 : vector<8x256xf32>
    %87 = tpu.concatenate %65, %68, %71, %74, %60, %77, %80, %83, %86 in 0 : vector<8x256xf32>, vector<8x256xf32>, vector<8x256xf32>, vector<8x256xf32>, vector<8x256xf32>, vector<8x256xf32>, vector<8x256xf32>, vector<8x256xf32>, vector<8x256xf32> -> vector<72x256xf32>
    %cst_40 = arith.constant dense<0.000000e+00> : vector<8x256xf32>
    %88 = tpu.matmul %61, %87, %cst_40 {dimension_numbers = #tpu.dot_dimension_numbers<[1], [0], [0], [1], [0, 0, 1, 1], [], []>} : vector<8x72xf32>, vector<72x256xf32>, vector<8x256xf32> -> vector<8x256xf32>
    %89 = vector.broadcast %62 : vector<8x1xf32> to vector<8x256xf32>
    %90 = arith.addf %88, %89 : vector<8x256xf32>
    %cst_41 = arith.constant 0.000000e+00 : f32
    %91 = vector.broadcast %cst_41 : f32 to vector<8x256xf32>
    %92 = arith.minimumf %90, %91 : vector<8x256xf32>
    %cst_42 = arith.constant 5.000000e-01 : f32
    %93 = vector.broadcast %cst_42 : f32 to vector<8x256xf32>
    %94 = arith.mulf %93, %92 : vector<8x256xf32>
    %95 = math.tanh %94 : vector<8x256xf32>
    %cst_43 = arith.constant 2.000000e+00 : f32
    %96 = vector.broadcast %cst_43 : f32 to vector<8x256xf32>
    %97 = arith.mulf %96, %95 : vector<8x256xf32>
    %cst_44 = arith.constant 1.000000e+00 : f32
    %98 = vector.broadcast %cst_44 : f32 to vector<8x256xf32>
    %99 = arith.subf %98, %95 : vector<8x256xf32>
    %100 = arith.divf %97, %99 : vector<8x256xf32>
    %cst_45 = arith.constant 0.000000e+00 : f32
    %101 = vector.broadcast %cst_45 : f32 to vector<8x256xf32>
    %102 = arith.cmpf ogt, %90, %101 : vector<8x256xf32>
    %103 = arith.select %102, %90, %100 : vector<8x256xi1>, vector<8x256xf32>
    %c0_46 = arith.constant 0 : index
    %c0_47 = arith.constant 0 : index
    %104 = vector.load %arg7[%c0_46, %c0_47] : memref<8x72xf32, #tpu.memory_space<vmem>>, vector<8x72xf32>
    %c0_48 = arith.constant 0 : index
    %c0_49 = arith.constant 0 : index
    %105 = vector.load %arg8[%c0_48, %c0_49] : memref<8x1xf32, #tpu.memory_space<vmem>>, vector<8x1xf32>
    %c17_i32_50 = arith.constant 17 : i32
    %106 = tpu.dynamic_rotate %103 by %c17_i32_50 dim 1 : vector<8x256xf32>, i32 -> vector<8x256xf32>
    %107 = vector.broadcast %1 : vector<1x256xf32> to vector<8x256xf32>
    %108 = arith.mulf %106, %107 : vector<8x256xf32>
    %c16_i32_51 = arith.constant 16 : i32
    %109 = tpu.dynamic_rotate %103 by %c16_i32_51 dim 1 : vector<8x256xf32>, i32 -> vector<8x256xf32>
    %110 = vector.broadcast %3 : vector<1x256xf32> to vector<8x256xf32>
    %111 = arith.mulf %109, %110 : vector<8x256xf32>
    %c15_i32_52 = arith.constant 15 : i32
    %112 = tpu.dynamic_rotate %103 by %c15_i32_52 dim 1 : vector<8x256xf32>, i32 -> vector<8x256xf32>
    %113 = vector.broadcast %5 : vector<1x256xf32> to vector<8x256xf32>
    %114 = arith.mulf %112, %113 : vector<8x256xf32>
    %c1_i32_53 = arith.constant 1 : i32
    %115 = tpu.dynamic_rotate %103 by %c1_i32_53 dim 1 : vector<8x256xf32>, i32 -> vector<8x256xf32>
    %116 = vector.broadcast %7 : vector<1x256xf32> to vector<8x256xf32>
    %117 = arith.mulf %115, %116 : vector<8x256xf32>
    %c255_i32_54 = arith.constant 255 : i32
    %118 = tpu.dynamic_rotate %103 by %c255_i32_54 dim 1 : vector<8x256xf32>, i32 -> vector<8x256xf32>
    %119 = vector.broadcast %9 : vector<1x256xf32> to vector<8x256xf32>
    %120 = arith.mulf %118, %119 : vector<8x256xf32>
    %c241_i32_55 = arith.constant 241 : i32
    %121 = tpu.dynamic_rotate %103 by %c241_i32_55 dim 1 : vector<8x256xf32>, i32 -> vector<8x256xf32>
    %122 = vector.broadcast %11 : vector<1x256xf32> to vector<8x256xf32>
    %123 = arith.mulf %121, %122 : vector<8x256xf32>
    %c240_i32_56 = arith.constant 240 : i32
    %124 = tpu.dynamic_rotate %103 by %c240_i32_56 dim 1 : vector<8x256xf32>, i32 -> vector<8x256xf32>
    %125 = vector.broadcast %13 : vector<1x256xf32> to vector<8x256xf32>
    %126 = arith.mulf %124, %125 : vector<8x256xf32>
    %c239_i32_57 = arith.constant 239 : i32
    %127 = tpu.dynamic_rotate %103 by %c239_i32_57 dim 1 : vector<8x256xf32>, i32 -> vector<8x256xf32>
    %128 = vector.broadcast %15 : vector<1x256xf32> to vector<8x256xf32>
    %129 = arith.mulf %127, %128 : vector<8x256xf32>
    %130 = tpu.concatenate %108, %111, %114, %117, %103, %120, %123, %126, %129 in 0 : vector<8x256xf32>, vector<8x256xf32>, vector<8x256xf32>, vector<8x256xf32>, vector<8x256xf32>, vector<8x256xf32>, vector<8x256xf32>, vector<8x256xf32>, vector<8x256xf32> -> vector<72x256xf32>
    %cst_58 = arith.constant dense<0.000000e+00> : vector<8x256xf32>
    %131 = tpu.matmul %104, %130, %cst_58 {dimension_numbers = #tpu.dot_dimension_numbers<[1], [0], [0], [1], [0, 0, 1, 1], [], []>} : vector<8x72xf32>, vector<72x256xf32>, vector<8x256xf32> -> vector<8x256xf32>
    %132 = vector.broadcast %105 : vector<8x1xf32> to vector<8x256xf32>
    %133 = arith.addf %131, %132 : vector<8x256xf32>
    %cst_59 = arith.constant 0.000000e+00 : f32
    %134 = vector.broadcast %cst_59 : f32 to vector<8x256xf32>
    %135 = arith.minimumf %133, %134 : vector<8x256xf32>
    %cst_60 = arith.constant 5.000000e-01 : f32
    %136 = vector.broadcast %cst_60 : f32 to vector<8x256xf32>
    %137 = arith.mulf %136, %135 : vector<8x256xf32>
    %138 = math.tanh %137 : vector<8x256xf32>
    %cst_61 = arith.constant 2.000000e+00 : f32
    %139 = vector.broadcast %cst_61 : f32 to vector<8x256xf32>
    %140 = arith.mulf %139, %138 : vector<8x256xf32>
    %cst_62 = arith.constant 1.000000e+00 : f32
    %141 = vector.broadcast %cst_62 : f32 to vector<8x256xf32>
    %142 = arith.subf %141, %138 : vector<8x256xf32>
    %143 = arith.divf %140, %142 : vector<8x256xf32>
    %cst_63 = arith.constant 0.000000e+00 : f32
    %144 = vector.broadcast %cst_63 : f32 to vector<8x256xf32>
    %145 = arith.cmpf ogt, %133, %144 : vector<8x256xf32>
    %146 = arith.select %145, %133, %143 : vector<8x256xi1>, vector<8x256xf32>
    %c0_64 = arith.constant 0 : index
    %c0_65 = arith.constant 0 : index
    %c0_66 = arith.constant 0 : index
    %147 = vector.load %arg9[%c0_64, %c0_65, %c0_66] : memref<1x8x256xf32, #tpu.memory_space<vmem>>, vector<1x8x256xf32>
    %148 = vector.shape_cast %147 : vector<1x8x256xf32> to vector<8x256xf32>
    %149 = vector.shape_cast %146 : vector<8x256xf32> to vector<1x8x256xf32>
    tpu.vector_store %arg9[%c0_64, %c0_65, %c0_66], %149 {strides = array<i32>} : memref<1x8x256xf32, #tpu.memory_space<vmem>>, vector<1x8x256xf32>,
    return
  }
  func.func @transform_0(%arg0: i32) -> (i32, i32, i32) {
    %c0_i32 = arith.constant 0 : i32
    %c0_i32_0 = arith.constant 0 : i32
    %c0_i32_1 = arith.constant 0 : i32
    %c0_i32_2 = arith.constant 0 : i32
    return %c0_i32, %c0_i32_0, %c0_i32_1 : i32, i32, i32
  }
  func.func @transform_1(%arg0: i32) -> (i32, i32, i32) {
    %c0_i32 = arith.constant 0 : i32
    %c0_i32_0 = arith.constant 0 : i32
    %c0_i32_1 = arith.constant 0 : i32
    return %arg0, %c0_i32, %c0_i32_0 : i32, i32, i32
  }
  func.func @transform_2(%arg0: i32) -> (i32, i32) {
    %c0_i32 = arith.constant 0 : i32
    %c0_i32_0 = arith.constant 0 : i32
    %c0_i32_1 = arith.constant 0 : i32
    return %c0_i32, %c0_i32_0 : i32, i32
  }
  func.func @transform_3(%arg0: i32) -> (i32, i32) {
    %c0_i32 = arith.constant 0 : i32
    %c0_i32_0 = arith.constant 0 : i32
    %c0_i32_1 = arith.constant 0 : i32
    return %c0_i32, %c0_i32_0 : i32, i32
  }
  func.func @transform_4(%arg0: i32) -> (i32, i32) {
    %c0_i32 = arith.constant 0 : i32
    %c0_i32_0 = arith.constant 0 : i32
    %c0_i32_1 = arith.constant 0 : i32
    return %c0_i32, %c0_i32_0 : i32, i32
  }
  func.func @transform_5(%arg0: i32) -> (i32, i32) {
    %c0_i32 = arith.constant 0 : i32
    %c0_i32_0 = arith.constant 0 : i32
    %c0_i32_1 = arith.constant 0 : i32
    return %c0_i32, %c0_i32_0 : i32, i32
  }
  func.func @transform_6(%arg0: i32) -> (i32, i32) {
    %c0_i32 = arith.constant 0 : i32
    %c0_i32_0 = arith.constant 0 : i32
    %c0_i32_1 = arith.constant 0 : i32
    return %c0_i32, %c0_i32_0 : i32, i32
  }
  func.func @transform_7(%arg0: i32) -> (i32, i32) {
    %c0_i32 = arith.constant 0 : i32
    %c0_i32_0 = arith.constant 0 : i32
    %c0_i32_1 = arith.constant 0 : i32
    return %c0_i32, %c0_i32_0 : i32, i32
  }
  func.func @transform_8(%arg0: i32) -> (i32, i32, i32) {
    %c0_i32 = arith.constant 0 : i32
    %c0_i32_0 = arith.constant 0 : i32
    %c0_i32_1 = arith.constant 0 : i32
    return %arg0, %c0_i32, %c0_i32_0 : i32, i32, i32
  }
}

</mosaic_0001>

<bundles_post_ra>
// kernel: field_cnn_forward.1
= control target key start
LH: loop header
LB: loop body
LE: loop exit
PB: predicated region body
PF: predicated region fallthrough
CT: control target
= control target key end

     0   :  { %s1146_s27 = smov 0   ;;  %s1516_s0 = inlined_call_operand.vmem [shape: f32[9,1,256], index: 0, kind: input, shape index: {}]   ;;  %s1517_s1 = inlined_call_operand.vmem [shape: f32[2,8,256], index: 1, kind: input, shape index: {}]   ;;  %s1518_s2 = inlined_call_operand.vmem [shape: f32[8,72], index: 2, kind: input, shape index: {}]   ;;  %s1519_s3 = inlined_call_operand.vmem [shape: f32[8,1], index: 3, kind: input, shape index: {}]   ;;  %s1520_s4 = inlined_call_operand.vmem [shape: f32[8,72], index: 4, kind: input, shape index: {}]   ;;  %s1521_s5 = inlined_call_operand.vmem [shape: f32[8,1], index: 5, kind: input, shape index: {}]   ;;  %s1522_s6 = inlined_call_operand.vmem [shape: f32[8,72], index: 6, kind: input, shape index: {}]   ;;  %s1523_s7 = inlined_call_operand.vmem [shape: f32[8,1], index: 7, kind: input, shape index: {}]   ;;  %s1524_s8 = inlined_call_operand.vmem [shape: f32[2,8,256], index: 8, kind: output, shape index: {}]  }
   0x1 LB: > { %s968_s28 = sadd.s32 4294967295, %s1089_s27   ;;  %p972_p0 = scmp.ge.s32.totalorder %s1089_s27, 1  ;;  %s1089_s27 = sphi %s1146_s27, %s18_s27  }
   0x2   : > { %p262_p1 = scmp.lt.s32.totalorder %s1089_s27, 3 }
   0x4   : > { %p263_p2 = pnand %p972_p0, %p262_p1 }
   0x5   : > { %p296_p3 = scmp.lt.s32.totalorder (!%p263_p2), %s968_s28, 1  ;;  %s1091_s11 = smov (!%p263_p2), 16   ;;  %v1097_v2 = vmov (!%p263_p2), 0.0   ;;  %v1098_v3 = vmov (!%p263_p2), 0   ;;  %v324_v4 = vld [vmem:[%s1519_s3] sm:$0xff] (!%p263_p2)  ;;  %v329_v5 = vlaneseq (!%p263_p2)  ;;  %vm492_vm8 = vcmask (!%p263_p2), 588800  }
   0x6   : > { %266 = sbr.rel (%p263_p2) target bundleno = 1209 (0x4b9), region = 52  ;;  %s1092_s12 = smov (!%p263_p2), 17   ;;  %560 = vmatprep.mubr.f32.mxu0 (!%p263_p2), %v1097_v2  ;;  %723 = vmatprep.mubr.f32.mxu1 (!%p263_p2), %v1097_v2  ;;  %v977_v10 = vld [vmem:[%s1516_s0 + $0x2] sm:$0x3] (!%p263_p2)  ;;  %v306_v11 = vld [vmem:[%s1516_s0] sm:$0x3] (!%p263_p2) }
   0x7   : > { %s1093_s13 = smov (!%p263_p2), 15   ;;  %s1094_s14 = smov (!%p263_p2), 1   ;;  %1057 = vset.pattern.permute.xlu0 (!%p263_p2), %v1098_v3  ;;  %1058 = vset.pattern.permute.xlu1 (!%p263_p2), %v1098_v3  ;;  %v336_v6 = vshrl.u32 (!%p263_p2), %v329_v5, 7  ;;  %v1203_v7 = vand.u32 (!%p263_p2), 127, %v329_v5  ;;  %v978_v28 = vld [vmem:[%s1516_s0 + $0x4] sm:$0x3] (!%p263_p2) }
   0x8   : > { %s1095_s15 = smov (!%p263_p2), 127   ;;  %s1096_s16 = smov (!%p263_p2), 113   ;;  %v979_v29 = vld [vmem:[%s1516_s0 + $0x6] sm:$0x3] (!%p263_p2)  ;;  %v980_v38 = vld [vmem:[%s1516_s0 + $0xa] sm:$0x3] (!%p263_p2) }
   0x9   : > { %s1099_s17 = smov (!%p263_p2), 112   ;;  %s1100_s18 = smov (!%p263_p2), 111   ;;  %v1205_v8 = vsub.s32 (!%p263_p2), 0, %v336_v6  ;;  %v1207_v9 = vsub.s32 (!%p263_p2), 1, %v336_v6  ;;  %vm351_vm0 = vcmp.lt.s32.totalorder (!%p263_p2), %v1203_v7, 16  ;;  %vm331_vm1 = vcmp.lt.s32.totalorder (!%p263_p2), %v1203_v7, 17 }
   0xa   : > { %vm371_vm2 = vcmp.lt.s32.totalorder (!%p263_p2), %v1203_v7, 15  ;;  %vm391_vm3 = vcmp.lt.s32.totalorder (!%p263_p2), %v1203_v7, 1  ;;  %vm411_vm4 = vcmp.lt.s32.totalorder (!%p263_p2), %v1203_v7, 127  ;;  %v981_v59 = vld [vmem:[%s1516_s0 + $0xc] sm:$0x3] (!%p263_p2)  ;;  %vm431_vm5 = vcmp.lt.s32.totalorder (!%p263_p2), %v1203_v7, 113 }
   0xb   : > { %v1218_v14 = vrot.slane (!%p263_p2), %v977_v10, %v1205_v8  ;;  %v1221_v15 = vrot.slane (!%p263_p2), %v306_v11, %v1205_v8  ;;  %v1224_v16 = vrot.slane (!%p263_p2), %v306_v11, %v1207_v9  ;;  %v1227_v17 = vrot.slane (!%p263_p2), %v977_v10, %v1207_v9  ;;  %v982_v60 = vld [vmem:[%s1516_s0 + $0xe] sm:$0x3] (!%p263_p2) }
   0xc   : > { %v1250_v34 = vrot.slane (!%p263_p2), %v978_v28, %v1205_v8  ;;  %v1253_v35 = vrot.slane (!%p263_p2), %v978_v28, %v1207_v9  ;;  %v1256_v36 = vrot.slane (!%p263_p2), %v979_v29, %v1205_v8  ;;  %v1259_v37 = vrot.slane (!%p263_p2), %v979_v29, %v1207_v9 }
   0xd   : > { %s1526_s28 = smov (!%p296_p3, %s968_s28), 1  ;;  %v1274_v45 = vrot.slane %v980_v38, %v1205_v8  ;;  %v1277_v46 = vrot.slane %v980_v38, %v1207_v9  ;;  %v1302_v5 = vrot.slane %v981_v59, %v1207_v9  ;;  %vm451_vm6 = vcmp.lt.s32.totalorder %v1203_v7, 112 }
   0xe   : > { %s989_s29 = sshll.u32 %s1526_s28, 4  ;;  %v1306_v6 = vrot.slane %v982_v60, %v1205_v8  ;;  %v1309_v10 = vrot.slane %v982_v60, %v1207_v9  ;;  %vm471_vm7 = vcmp.lt.s32.totalorder %v1203_v7, 111 }
   0xf   : > { %s300_s10 = scalar_lea.vmem %s1517_s1, %s989_s29 }
  0x10   : > { %v1162_v0 = vld [vmem:[%s300_s10] sm:$0xff]  ;;  %v1168_v1 = vld [vmem:[%s300_s10 + $0x8] sm:$0xff] }
  0x11   : > { %347 = vrot.lane.b32.xlu1 %v1162_v0, %s1091_s11  ;;  %325 = vrot.lane.b32.xlu0 %v1162_v0, %s1092_s12 }
  0x15   : > { %349 = vrot.lane.b32.xlu1 %v1168_v1, %s1091_s11  ;;  %327 = vrot.lane.b32.xlu0 %v1168_v1, %s1092_s12 }
  0x19   : > { %369 = vrot.lane.b32.xlu1 %v1168_v1, %s1093_s13  ;;  %367 = vrot.lane.b32.xlu0 %v1162_v0, %s1093_s13 }
  0x1d   : > { %389 = vrot.lane.b32.xlu1 %v1168_v1, %s1094_s14  ;;  %387 = vrot.lane.b32.xlu0 %v1162_v0, %s1094_s14 }
  0x21   : > { %409 = vrot.lane.b32.xlu1 %v1168_v1, %s1095_s15  ;;  %407 = vrot.lane.b32.xlu0 %v1162_v0, %s1095_s15 }
  0x25   : > { %429 = vrot.lane.b32.xlu1 %v1168_v1, %s1096_s16  ;;  %427 = vrot.lane.b32.xlu0 %v1162_v0, %s1096_s16 }
  0x29   : > { %449 = vrot.lane.b32.xlu1 %v1168_v1, %s1099_s17  ;;  %447 = vrot.lane.b32.xlu0 %v1162_v0, %s1099_s17 }
  0x2d   : > { %469 = vrot.lane.b32.xlu1 %v1168_v1, %s1100_s18  ;;  %467 = vrot.lane.b32.xlu0 %v1162_v0, %s1100_s18 }
  0x31   : > { %489 = vperm.xlu0 %1057, %v324_v4   ;;  %v1299_v4 = vrot.slane %v981_v59, %v1205_v8  ;;  %v586_v59 = vld [vmem:[%s1521_s5] sm:$0xff] }
  0x83   : > { %v348_v12 = vpop.permute.xlu1 %347  ;;  %v326_v13 = vpop.permute.xlu0 %325 }
  0x87   : > { %v350_v18 = vpop.permute.xlu1 %349  ;;  %v328_v19 = vpop.permute.xlu0 %327 }
  0x88   : > { %v352_v20 = vsel %vm351_vm0, %v348_v12, %v350_v18  ;;  %v353_v21 = vsel %vm351_vm0, %v350_v18, %v348_v12  ;;  %v332_v22 = vsel %vm331_vm1, %v326_v13, %v328_v19  ;;  %v333_v23 = vsel %vm331_vm1, %v328_v19, %v326_v13 }
  0x89   : > { %v365_v24 = vmul.f32 %v1218_v14, %v353_v21  ;;  %v345_v25 = vmul.f32 %v1221_v15, %v333_v23  ;;  %v346_v26 = vmul.f32 %v1224_v16, %v332_v22  ;;  %v366_v27 = vmul.f32 %v1227_v17, %v352_v20 }
  0x8b   : > { %v370_v30 = vpop.permute.xlu1 %369  ;;  %v368_v31 = vpop.permute.xlu0 %367  ;;  %v991_v32 = vpack.c.bf16 %v366_v27, %v346_v26  ;;  %v993_v33 = vpack.c.bf16 %v365_v24, %v345_v25 }
  0x8c   : > { %v372_v39 = vsel %vm371_vm2, %v368_v31, %v370_v30  ;;  %v373_v40 = vsel %vm371_vm2, %v370_v30, %v368_v31 }
  0x8d   : > { %992 = vmatprep.subr.bf16.mxu0 %v991_v32  ;;  %v385_v47 = vmul.f32 %v1250_v34, %v373_v40  ;;  %v386_v48 = vmul.f32 %v1253_v35, %v372_v39 }
  0x8e   : > { %994 = vmatpush1.bf16.msra.mxu0 %v993_v33 }
  0x8f   : > { %v390_v41 = vpop.permute.xlu1 %389  ;;  %v388_v42 = vpop.permute.xlu0 %387 }
  0x90   : > { %v392_v43 = vsel %vm391_vm3, %v388_v42, %v390_v41  ;;  %v393_v44 = vsel %vm391_vm3, %v390_v41, %v388_v42 }
  0x91   : > { %v405_v49 = vmul.f32 %v1256_v36, %v393_v44  ;;  %v406_v50 = vmul.f32 %v1259_v37, %v392_v43 }
  0x93   : > { %v410_v51 = vpop.permute.xlu1 %409  ;;  %v408_v52 = vpop.permute.xlu0 %407  ;;  %v995_v53 = vpack.c.bf16 %v406_v50, %v386_v48  ;;  %v997_v54 = vpack.c.bf16 %v405_v49, %v385_v47 }
  0x94   : > { %v412_v55 = vsel %vm411_vm4, %v408_v52, %v410_v51  ;;  %v413_v56 = vsel %vm411_vm4, %v410_v51, %v408_v52 }
  0x95   : > { %v425_v57 = vmul.f32 %v1274_v45, %v412_v55  ;;  %v426_v58 = vmul.f32 %v1277_v46, %v413_v56  ;;  %996 = vmatprep.subr.bf16.mxu0 %v995_v53 }
  0x96   : > { %998 = vmatpush1.bf16.msra.mxu0 %v997_v54 }
  0x97   : > { %v430_v61 = vpop.permute.xlu1 %429  ;;  %v428_v62 = vpop.permute.xlu0 %427  ;;  %v999_v63 = vpack.c.bf16 %v426_v58, %v1168_v1  ;;  %v1001_v3 = vpack.c.bf16 %v425_v57, %v1162_v0  ;;  %v983_v1 = vld [vmem:[%s1516_s0 + $0x10] sm:$0x3] }
  0x98   : > { %v432_v0 = vsel %vm431_vm5, %v428_v62, %v430_v61  ;;  %v433_v11 = vsel %vm431_vm5, %v430_v61, %v428_v62  ;;  %v1324_v20 = vrot.slane %v983_v1, %v1207_v9  ;;  %v1331_v25 = vrot.slane %v983_v1, %v1205_v8  ;;  %v323_v8 = vld [vmem:[%s1518_s2] sm:$0xff] }
  0x99   : > { %1000 = vmatprep.subr.bf16.mxu0 %v999_v63  ;;  %v445_v21 = vmul.f32 %v1299_v4, %v432_v0  ;;  %v446_v22 = vmul.f32 %v1302_v5, %v433_v11 }
  0x9a   : > { %1002 = vmatpush1.bf16.msra.mxu0 %v1001_v3 }
  0x9b   : > { %v450_v12 = vpop.permute.xlu1 %449  ;;  %v448_v13 = vpop.permute.xlu0 %447 }
  0x9c   : > { %v452_v18 = vsel %vm451_vm6, %v448_v13, %v450_v12  ;;  %v453_v19 = vsel %vm451_vm6, %v450_v12, %v448_v13 }
  0x9d   : > { %v465_v23 = vmul.f32 %v1306_v6, %v452_v18  ;;  %v466_v24 = vmul.f32 %v1309_v10, %v453_v19 }
  0x9f   : > { %v470_v26 = vpop.permute.xlu1 %469  ;;  %v1003_v27 = vpack.c.bf16 %v466_v24, %v446_v22  ;;  %v468_v28 = vpop.permute.xlu0 %467  ;;  %v1005_v29 = vpack.c.bf16 %v465_v23, %v445_v21 }
  0xa0   : > { %v472_v30 = vsel %vm471_vm7, %v468_v28, %v470_v26  ;;  %v473_v9 = vsel %vm471_vm7, %v470_v26, %v468_v28 }
  0xa1   : > { %1004 = vmatprep.subr.bf16.mxu0 %v1003_v27  ;;  %v486_v31 = vmul.f32 %v1324_v20, %v473_v9  ;;  %v485_v32 = vmul.f32 %v1331_v25, %v472_v30 }
  0xa2   : > { %1006 = vmatpush1.bf16.msra.mxu0 %v1005_v29 }
  0xa3   : > { %512 = vmatprep.subr.mxu0 %v486_v31 }
  0xa6   : > { %513 = vmatpush1.msra.mxu0 %v485_v32 }
  0xa7   : > { %984 = vmatmul.mubr.msk.f32.vlgmr.msra.gmra.mrb[0].mxu0 %vm492_vm8, %v323_v8 }
  0xa8   : > { %886 = vmatprep.mubr.f32.mxu0 %v1097_v2 }
  0xb0   : > { %v490_v33 = vpop.permute.xlu0 %489 }
 0x17a   : > { %v562_v38 = vpop.f32.mrb[0].mxu0 }
 0x17b   : > { %v563_v39 = vadd.f32 %v562_v38, %v490_v33  ;;  %v564_v40 = vpop.f32.mrb[1].mxu0 }
 0x17c   : > { %v565_v41 = vadd.f32 %v564_v40, %v490_v33 }
 0x17d   : > { %v567_v42 = vmin.f32 %v563_v39, 0.0  ;;  %vm581_vm9 = vcmp.gt.f32.partialorder %v563_v39, 0.0 }
 0x17e   : > { %v568_v43 = vmin.f32 %v565_v41, 0.0  ;;  %vm582_vm10 = vcmp.gt.f32.partialorder %v565_v41, 0.0 }
 0x17f   : > { %v569_v44 = vmul.f32 0.5, %v567_v42 }
 0x180   : > { %v570_v47 = vmul.f32 0.5, %v568_v43 }
 0x181   : > { %1059 = vtanh.f32 %v569_v44 }
 0x182   : > { %1061 = vtanh.f32 %v570_v47 }
 0x18b   : > { %v1060_v48 = vpop.eup %1059 }
 0x18c   : > { %v1062_v49 = vpop.eup %1061  ;;  %v575_v50 = vsub.f32 1.0, %v1060_v48  ;;  %v573_v52 = vmul.f32 2.0, %v1060_v48 }
 0x18d   : > { %v576_v51 = vsub.f32 1.0, %v1062_v49  ;;  %v574_v55 = vmul.f32 2.0, %v1062_v49 }
 0x18e   : > { %1063 = vrcp.f32 %v575_v50 }
 0x18f   : > { %1065 = vrcp.f32 %v576_v51 }
 0x198   : > { %v1064_v53 = vpop.eup %1063 }
 0x199   : > { %v1066_v2 = vpop.eup %1065  ;;  %v578_v54 = vmul.f32 %v1064_v53, %v573_v52 }
 0x19a   : > { %v580_v57 = vmul.f32 %v1066_v2, %v574_v55 }
 0x19b   : > { %v1344_v56 = vsel %vm581_vm9, %v563_v39, %v578_v54 }
 0x19c   : > { %595 = vrot.lane.b32.xlu0 %v1344_v56, %s1091_s11  ;;  %587 = vrot.lane.b32.xlu1 %v1344_v56, %s1092_s12  ;;  %v584_v58 = vsel %vm582_vm10, %v565_v41, %v580_v57 }
 0x1a0   : > { %603 = vrot.lane.b32.xlu0 %v1344_v56, %s1093_s13  ;;  %589 = vrot.lane.b32.xlu1 %v584_v58, %s1092_s12 }
 0x1a4   : > { %611 = vrot.lane.b32.xlu0 %v1344_v56, %s1094_s14  ;;  %597 = vrot.lane.b32.xlu1 %v584_v58, %s1091_s11 }
 0x1a8   : > { %619 = vrot.lane.b32.xlu0 %v1344_v56, %s1095_s15  ;;  %605 = vrot.lane.b32.xlu1 %v584_v58, %s1093_s13 }
 0x1ac   : > { %627 = vrot.lane.b32.xlu0 %v1344_v56, %s1096_s16  ;;  %613 = vrot.lane.b32.xlu1 %v584_v58, %s1094_s14 }
 0x1b0   : > { %635 = vrot.lane.b32.xlu0 %v1344_v56, %s1099_s17  ;;  %621 = vrot.lane.b32.xlu1 %v584_v58, %s1095_s15 }
 0x1b4   : > { %643 = vrot.lane.b32.xlu0 %v1344_v56, %s1100_s18  ;;  %629 = vrot.lane.b32.xlu1 %v584_v58, %s1096_s16 }
 0x1b8   : > { %653 = vperm.xlu0 %1057, %v586_v59   ;;  %637 = vrot.lane.b32.xlu1 %v584_v58, %s1099_s17 }
 0x1bc   : > { %645 = vrot.lane.b32.xlu1 %v584_v58, %s1100_s18 }
 0x20e   : > { %v596_v60 = vpop.permute.xlu0 %595  ;;  %v588_v61 = vpop.permute.xlu1 %587 }
 0x212   : > { %v604_v62 = vpop.permute.xlu0 %603  ;;  %v590_v63 = vpop.permute.xlu1 %589 }
 0x213   : > { %v591_v3 = vsel %vm331_vm1, %v588_v61, %v590_v63  ;;  %v592_v1 = vsel %vm331_vm1, %v590_v63, %v588_v61 }
 0x214   : > { %v593_v18 = vmul.f32 %v592_v1, %v1221_v15  ;;  %v594_v21 = vmul.f32 %v591_v3, %v1224_v16 }
 0x216   : > { %v612_v0 = vpop.permute.xlu0 %611  ;;  %v598_v11 = vpop.permute.xlu1 %597 }
 0x217   : > { %v599_v12 = vsel %vm351_vm0, %v596_v60, %v598_v11  ;;  %v600_v13 = vsel %vm351_vm0, %v598_v11, %v596_v60 }
 0x218   : > { %v601_v19 = vmul.f32 %v600_v13, %v1218_v14  ;;  %v602_v22 = vmul.f32 %v599_v12, %v1227_v17  ;;  %v585_v13 = vld [vmem:[%s1520_s4] sm:$0xff] }
 0x21a   : > { %v606_v23 = vpop.permute.xlu1 %605  ;;  %v1007_v24 = vpack.c.bf16 %v602_v22, %v594_v21  ;;  %v1009_v26 = vpack.c.bf16 %v601_v19, %v593_v18  ;;  %v620_v27 = vpop.permute.xlu0 %619 }
 0x21b   : > { %v607_v28 = vsel %vm371_vm2, %v604_v62, %v606_v23  ;;  %v608_v29 = vsel %vm371_vm2, %v606_v23, %v604_v62 }
 0x21c   : > { %1008 = vmatprep.subr.bf16.mxu1 %v1007_v24  ;;  %v609_v32 = vmul.f32 %v608_v29, %v1250_v34  ;;  %v610_v8 = vmul.f32 %v607_v28, %v1253_v35 }
 0x21d   : > { %1010 = vmatpush1.bf16.msra.mxu1 %v1009_v26 }
 0x21e   : > { %v614_v30 = vpop.permute.xlu1 %613  ;;  %v628_v39 = vpop.permute.xlu0 %627 }
 0x21f   : > { %v615_v9 = vsel %vm391_vm3, %v612_v0, %v614_v30  ;;  %v616_v31 = vsel %vm391_vm3, %v614_v30, %v612_v0 }
 0x220   : > { %v617_v33 = vmul.f32 %v616_v31, %v1256_v36  ;;  %v618_v38 = vmul.f32 %v615_v9, %v1259_v37 }
 0x222   : > { %v622_v40 = vpop.permute.xlu1 %621  ;;  %v1011_v41 = vpack.c.bf16 %v618_v38, %v610_v8  ;;  %v1013_v42 = vpack.c.bf16 %v617_v33, %v609_v32  ;;  %v636_v52 = vpop.permute.xlu0 %635 }
 0x223   : > { %v623_v43 = vsel %vm411_vm4, %v620_v27, %v622_v40  ;;  %v624_v44 = vsel %vm411_vm4, %v622_v40, %v620_v27 }
 0x224   : > { %v625_v47 = vmul.f32 %v623_v43, %v1274_v45  ;;  %v626_v48 = vmul.f32 %v624_v44, %v1277_v46  ;;  %1012 = vmatprep.subr.bf16.mxu1 %v1011_v41  ;;  %v749_v43 = vld [vmem:[%s1523_s7] sm:$0xff] }
 0x225   : > { %1014 = vmatpush1.bf16.msra.mxu1 %v1013_v42 }
 0x226   : > { %v630_v49 = vpop.permute.xlu1 %629  ;;  %v1015_v50 = vpack.c.bf16 %v626_v48, %v584_v58  ;;  %v1017_v51 = vpack.c.bf16 %v625_v47, %v1344_v56  ;;  %v644_v61 = vpop.permute.xlu0 %643 }
 0x227   : > { %v631_v53 = vsel %vm431_vm5, %v628_v39, %v630_v49  ;;  %v632_v2 = vsel %vm431_vm5, %v630_v49, %v628_v39 }
 0x228   : > { %1016 = vmatprep.subr.bf16.mxu1 %v1015_v50  ;;  %v633_v58 = vmul.f32 %v631_v53, %v1299_v4  ;;  %v634_v56 = vmul.f32 %v632_v2, %v1302_v5 }
 0x229   : > { %1018 = vmatpush1.bf16.msra.mxu1 %v1017_v51 }
 0x22a   : > { %v638_v54 = vpop.permute.xlu1 %637 }
 0x22b   : > { %v639_v55 = vsel %vm451_vm6, %v636_v52, %v638_v54  ;;  %v640_v57 = vsel %vm451_vm6, %v638_v54, %v636_v52 }
 0x22c   : > { %v641_v59 = vmul.f32 %v639_v55, %v1306_v6  ;;  %v642_v60 = vmul.f32 %v640_v57, %v1309_v10 }
 0x22e   : > { %v646_v62 = vpop.permute.xlu1 %645  ;;  %v1019_v63 = vpack.c.bf16 %v642_v60, %v634_v56  ;;  %v1021_v3 = vpack.c.bf16 %v641_v59, %v633_v58 }
 0x22f   : > { %v648_v1 = vsel %vm471_vm7, %v646_v62, %v644_v61  ;;  %v647_v0 = vsel %vm471_vm7, %v644_v61, %v646_v62 }
 0x230   : > { %v650_v11 = vmul.f32 %v648_v1, %v1324_v20  ;;  %1020 = vmatprep.subr.bf16.mxu1 %v1019_v63  ;;  %v649_v12 = vmul.f32 %v647_v0, %v1331_v25 }
 0x231   : > { %1022 = vmatpush1.bf16.msra.mxu1 %v1021_v3 }
 0x232   : > { %675 = vmatprep.subr.mxu1 %v650_v11 }
 0x235   : > { %676 = vmatpush1.msra.mxu1 %v649_v12 }
 0x236   : > { %985 = vmatmul.mubr.msk.f32.vlgmr.msra.gmra.mrb[0].mxu1 %vm492_vm8, %v585_v13 }
 0x237   : > { %v654_v18 = vpop.permute.xlu0 %653 }
 0x309   : > { %v725_v19 = vpop.f32.mrb[0].mxu1 }
 0x30a   : > { %v726_v21 = vadd.f32 %v725_v19, %v654_v18  ;;  %v727_v22 = vpop.f32.mrb[1].mxu1 }
 0x30b   : > { %v728_v23 = vadd.f32 %v727_v22, %v654_v18 }
 0x30c   : > { %v730_v24 = vmin.f32 %v726_v21, 0.0  ;;  %vm744_vm11 = vcmp.gt.f32.partialorder %v726_v21, 0.0 }
 0x30d   : > { %v731_v26 = vmin.f32 %v728_v23, 0.0  ;;  %vm745_vm12 = vcmp.gt.f32.partialorder %v728_v23, 0.0 }
 0x30e   : > { %v732_v27 = vmul.f32 0.5, %v730_v24 }
 0x30f   : > { %v733_v28 = vmul.f32 0.5, %v731_v26 }
 0x310   : > { %1067 = vtanh.f32 %v732_v27 }
 0x311   : > { %1069 = vtanh.f32 %v733_v28 }
 0x31a   : > { %v1068_v29 = vpop.eup %1067 }
 0x31b   : > { %v1070_v30 = vpop.eup %1069  ;;  %v738_v9 = vsub.f32 1.0, %v1068_v29  ;;  %v736_v32 = vmul.f32 2.0, %v1068_v29 }
 0x31c   : > { %v739_v31 = vsub.f32 1.0, %v1070_v30  ;;  %v737_v33 = vmul.f32 2.0, %v1070_v30 }
 0x31d   : > { %1071 = vrcp.f32 %v738_v9 }
 0x31e   : > { %1073 = vrcp.f32 %v739_v31 }
 0x327   : > { %v1072_v8 = vpop.eup %1071 }
 0x328   : > { %v1074_v38 = vpop.eup %1073  ;;  %v741_v39 = vmul.f32 %v1072_v8, %v736_v32 }
 0x329   : > { %v743_v40 = vmul.f32 %v1074_v38, %v737_v33 }
 0x32a   : > { %v1426_v41 = vsel %vm744_vm11, %v726_v21, %v741_v39 }
 0x32b   : > { %v747_v42 = vsel %vm745_vm12, %v728_v23, %v743_v40  ;;  %750 = vrot.lane.b32.xlu1 %v1426_v41, %s1092_s12 }
 0x32c   : > { %752 = vrot.lane.b32.xlu0 %v747_v42, %s1092_s12 }
 0x32f   : > { %758 = vrot.lane.b32.xlu1 %v1426_v41, %s1091_s11 }
 0x330   : > { %760 = vrot.lane.b32.xlu0 %v747_v42, %s1091_s11 }
 0x333   : > { %766 = vrot.lane.b32.xlu1 %v1426_v41, %s1093_s13 }
 0x334   : > { %768 = vrot.lane.b32.xlu0 %v747_v42, %s1093_s13 }
 0x337   : > { %774 = vrot.lane.b32.xlu1 %v1426_v41, %s1094_s14 }
 0x338   : > { %776 = vrot.lane.b32.xlu0 %v747_v42, %s1094_s14 }
 0x33b   : > { %782 = vrot.lane.b32.xlu1 %v1426_v41, %s1095_s15 }
 0x33c   : > { %784 = vrot.lane.b32.xlu0 %v747_v42, %s1095_s15 }
 0x33f   : > { %790 = vrot.lane.b32.xlu1 %v1426_v41, %s1096_s16 }
 0x340   : > { %792 = vrot.lane.b32.xlu0 %v747_v42, %s1096_s16 }
 0x343   : > { %798 = vrot.lane.b32.xlu1 %v1426_v41, %s1099_s17 }
 0x344   : > { %800 = vrot.lane.b32.xlu0 %v747_v42, %s1099_s17  ;;  %s305_s17 = scalar_lea.vmem %s1524_s8, %s989_s29 }
 0x347   : > { %806 = vrot.lane.b32.xlu1 %v1426_v41, %s1100_s18 }
 0x348   : > { %808 = vrot.lane.b32.xlu0 %v747_v42, %s1100_s18 }
 0x34b   : > { %816 = vperm.xlu1 %1058, %v749_v43  }
 0x39d   : > { %v751_v44 = vpop.permute.xlu1 %750 }
 0x39e   : > { %v753_v47 = vpop.permute.xlu0 %752 }
 0x39f   : > { %v754_v48 = vsel %vm331_vm1, %v751_v44, %v753_v47  ;;  %v755_v49 = vsel %vm331_vm1, %v753_v47, %v751_v44 }
 0x3a0   : > { %v756_v2 = vmul.f32 %v755_v49, %v1221_v15  ;;  %v757_v54 = vmul.f32 %v754_v48, %v1224_v16 }
 0x3a1   : > { %v759_v50 = vpop.permute.xlu1 %758 }
 0x3a2   : > { %v761_v51 = vpop.permute.xlu0 %760 }
 0x3a3   : > { %v762_v52 = vsel %vm351_vm0, %v759_v50, %v761_v51  ;;  %v763_v53 = vsel %vm351_vm0, %v761_v51, %v759_v50 }
 0x3a4   : > { %v764_v55 = vmul.f32 %v763_v53, %v1218_v14  ;;  %v765_v57 = vmul.f32 %v762_v52, %v1227_v17 }
 0x3a5   : > { %v767_v58 = vpop.permute.xlu1 %766 }
 0x3a6   : > { %v1025_v56 = vpack.c.bf16 %v764_v55, %v756_v2  ;;  %v769_v59 = vpop.permute.xlu0 %768  ;;  %v1023_v60 = vpack.c.bf16 %v765_v57, %v757_v54 }
 0x3a7   : > { %v770_v61 = vsel %vm371_vm2, %v767_v58, %v769_v59  ;;  %v771_v62 = vsel %vm371_vm2, %v769_v59, %v767_v58 }
 0x3a8   : > { %1024 = vmatprep.subr.bf16.mxu0 %v1023_v60  ;;  %v772_v17 = vmul.f32 %v771_v62, %v1250_v34  ;;  %v773_v3 = vmul.f32 %v770_v61, %v1253_v35 }
 0x3a9   : > { %1026 = vmatpush1.bf16.msra.mxu0 %v1025_v56  ;;  %v775_v63 = vpop.permute.xlu1 %774 }
 0x3aa   : > { %v777_v15 = vpop.permute.xlu0 %776 }
 0x3ab   : > { %v778_v16 = vsel %vm391_vm3, %v775_v63, %v777_v15  ;;  %v779_v14 = vsel %vm391_vm3, %v777_v15, %v775_v63 }
 0x3ac   : > { %v780_v1 = vmul.f32 %v779_v14, %v1256_v36  ;;  %v781_v0 = vmul.f32 %v778_v16, %v1259_v37 }
 0x3ad   : > { %v783_v11 = vpop.permute.xlu1 %782 }
 0x3ae   : > { %v1029_v12 = vpack.c.bf16 %v780_v1, %v772_v17  ;;  %v785_v13 = vpop.permute.xlu0 %784  ;;  %v1027_v18 = vpack.c.bf16 %v781_v0, %v773_v3 }
 0x3af   : > { %v786_v19 = vsel %vm411_vm4, %v783_v11, %v785_v13  ;;  %v787_v21 = vsel %vm411_vm4, %v785_v13, %v783_v11 }
 0x3b0   : > { %v788_v22 = vmul.f32 %v786_v19, %v1274_v45  ;;  %v789_v34 = vmul.f32 %v787_v21, %v1277_v46  ;;  %1028 = vmatprep.subr.bf16.mxu0 %v1027_v18 }
 0x3b1   : > { %1030 = vmatpush1.bf16.msra.mxu0 %v1029_v12  ;;  %v791_v35 = vpop.permute.xlu1 %790 }
 0x3b2   : > { %v1033_v36 = vpack.c.bf16 %v788_v22, %v1426_v41  ;;  %v793_v37 = vpop.permute.xlu0 %792  ;;  %v1031_v23 = vpack.c.bf16 %v789_v34, %v747_v42 }
 0x3b3   : > { %v794_v24 = vsel %vm431_vm5, %v791_v35, %v793_v37  ;;  %v795_v26 = vsel %vm431_vm5, %v793_v37, %v791_v35 }
 0x3b4   : > { %1032 = vmatprep.subr.bf16.mxu0 %v1031_v23  ;;  %v796_v29 = vmul.f32 %v794_v24, %v1299_v4  ;;  %v797_v30 = vmul.f32 %v795_v26, %v1302_v5  ;;  %v748_v5 = vld [vmem:[%s1522_s6] sm:$0xff] }
 0x3b5   : > { %1034 = vmatpush1.bf16.msra.mxu0 %v1033_v36  ;;  %v799_v27 = vpop.permute.xlu1 %798 }
 0x3b6   : > { %v801_v28 = vpop.permute.xlu0 %800 }
 0x3b7   : > { %v802_v45 = vsel %vm451_vm6, %v799_v27, %v801_v28  ;;  %v803_v46 = vsel %vm451_vm6, %v801_v28, %v799_v27 }
 0x3b8   : > { %v804_v9 = vmul.f32 %v802_v45, %v1306_v6  ;;  %v805_v31 = vmul.f32 %v803_v46, %v1309_v10 }
 0x3b9   : > { %v807_v32 = vpop.permute.xlu1 %806 }
 0x3ba   : > { %v1037_v8 = vpack.c.bf16 %v804_v9, %v796_v29  ;;  %v809_v33 = vpop.permute.xlu0 %808  ;;  %v1035_v38 = vpack.c.bf16 %v805_v31, %v797_v30 }
 0x3bb   : > { %v811_v39 = vsel %vm471_vm7, %v809_v33, %v807_v32  ;;  %v810_v40 = vsel %vm471_vm7, %v807_v32, %v809_v33 }
 0x3bc   : > { %v813_v41 = vmul.f32 %v811_v39, %v1324_v20  ;;  %1036 = vmatprep.subr.bf16.mxu0 %v1035_v38  ;;  %v812_v4 = vmul.f32 %v810_v40, %v1331_v25 }
 0x3bd   : > { %1038 = vmatpush1.bf16.msra.mxu0 %v1037_v8 }
 0x3be   : > { %838 = vmatprep.subr.mxu0 %v813_v41 }
 0x3c1   : > { %839 = vmatpush1.msra.mxu0 %v812_v4 }
 0x3c2   : > { %986 = vmatmul.mubr.msk.f32.vlgmr.msra.gmra.mrb[2].mxu0 %vm492_vm8, %v748_v5 }
 0x3ca   : > { %v817_v6 = vpop.permute.xlu1 %816 }
 0x495   : > { %v888_v10 = vpop.f32.mrb[2].mxu0 }
 0x496   : > { %v889_v42 = vadd.f32 %v888_v10, %v817_v6  ;;  %v890_v43 = vpop.f32.mrb[3].mxu0 }
 0x497   : > { %v891_v7 = vadd.f32 %v890_v43, %v817_v6 }
 0x498   : > { %v893_v44 = vmin.f32 %v889_v42, 0.0  ;;  %vm907_vm13 = vcmp.gt.f32.partialorder %v889_v42, 0.0 }
 0x499   : > { %v894_v20 = vmin.f32 %v891_v7, 0.0  ;;  %vm908_vm14 = vcmp.gt.f32.partialorder %v891_v7, 0.0 }
 0x49a   : > { %v895_v47 = vmul.f32 0.5, %v893_v44 }
 0x49b   : > { %v896_v48 = vmul.f32 0.5, %v894_v20 }
 0x49c   : > { %1075 = vtanh.f32 %v895_v47 }
 0x49d   : > { %1077 = vtanh.f32 %v896_v48 }
 0x4a6   : > { %v1076_v25 = vpop.eup %1075 }
 0x4a7   : > { %v1078_v49 = vpop.eup %1077  ;;  %v901_v50 = vsub.f32 1.0, %v1076_v25  ;;  %v899_v52 = vmul.f32 2.0, %v1076_v25 }
 0x4a8   : > { %v902_v51 = vsub.f32 1.0, %v1078_v49  ;;  %v900_v2 = vmul.f32 2.0, %v1078_v49 }
 0x4a9   : > { %1079 = vrcp.f32 %v901_v50 }
 0x4aa   : > { %1081 = vrcp.f32 %v902_v51 }
 0x4b3   : > { %v1080_v53 = vpop.eup %1079 }
 0x4b4   : > { %v1082_v54 = vpop.eup %1081  ;;  %v904_v55 = vmul.f32 %v1080_v53, %v899_v52 }
 0x4b5   : > { %v906_v57 = vmul.f32 %v1082_v54, %v900_v2 }
 0x4b6   : > { %v909_v58 = vsel %vm907_vm13, %v889_v42, %v904_v55 }
 0x4b7   : > { %911 = vst [vmem:[%s305_s17] sm:$0xff] %v909_v58  ;;  %v910_v56 = vsel %vm908_vm14, %v891_v7, %v906_v57 }
 0x4b8   : > { %912 = vst [vmem:[%s305_s17 + $0x8] sm:$0xff] %v910_v56 }
 0x4b9 PF: > { %s18_s27 = sadd.s32 1, %s1089_s27  }
 0x4ba   : > { %p15_p4 = scmp.ge.s32.totalorder %s18_s27, 4  }
 0x4bc   :  { %17 = sbr.rel (!%p15_p4) target bundleno = 1 (0x1), region = 89 }

</bundles_post_ra>
